<compile_context>
chip_gen: v7x
topology: tpu7x:2x2x1
jax: 0.10.0
libtpu: 0.0.40
codegen_flags: <defaults>
</compile_context>

<pallas_src>
import functools

import jax
import jax.numpy as jnp
from jax.experimental import pallas as pl
from jax.experimental.pallas import tpu as pltpu


def _round_up(x, m):
    return (x + m - 1) // m * m


def _transe_loss_kernel(idx_ref, ent_ref, rel_ref, out_ref, *,
                        margin, norm_p, batch, b_tile, ent_num, rel_num, dim):
    """One batch tile: gather rows, L-p triple distances, masked hinge sum."""
    tile = pl.program_id(0)

    idx = idx_ref[...]           # (b_tile, 8) int32  [h, r, t, hn, rn, tn, pad, pad]
    ent = ent_ref[...]           # (ent_num, dim) f32, VMEM-resident (small table)
    rel = rel_ref[...]           # (rel_num, dim) f32

    def gather(table, col, num_rows):
        ids = idx[:, col:col + 1]                                   # (b_tile, 1)
        onehot = (ids == jax.lax.broadcasted_iota(
            jnp.int32, (b_tile, num_rows), 1)).astype(jnp.float32)  # (b_tile, rows)
        # One-hot gather on the MXU (fused gather, no HBM round-trip).
        return jnp.dot(onehot, table, preferred_element_type=jnp.float32)

    def dist(h, r, t):
        d = h + r - t
        a = jnp.abs(d) if norm_p == 1 else d * d
        if dim >= 512:
            # Large D: do the cross-lane reduction on the MXU instead of the XLU.
            s = jnp.dot(a, jnp.ones((dim, 1), jnp.float32),
                        preferred_element_type=jnp.float32)          # (b_tile, 1)
        else:
            s = jnp.sum(a, axis=1, keepdims=True)                    # (b_tile, 1)
        return s if norm_p == 1 else jnp.sqrt(s)

    hp = gather(ent, 0, ent_num)
    rp = gather(rel, 1, rel_num)
    tp = gather(ent, 2, ent_num)
    hn = gather(ent, 3, ent_num)
    rn = gather(rel, 4, rel_num)
    tn = gather(ent, 5, ent_num)

    pos = dist(hp, rp, tp)                                           # (b_tile, 1)
    neg = dist(hn, rn, tn)                                           # (b_tile, 1)

    # nn.MarginRankingLoss with target = -1:
    #   mean( max(0, pos - neg + margin) )
    hinge = jnp.maximum(pos - neg + margin, 0.0)                     # (b_tile, 1)

    # Mask padded rows (batch padded up to a multiple of b_tile in the wrapper).
    row = tile * b_tile + jax.lax.broadcasted_iota(jnp.int32, (b_tile, 1), 0)
    hinge = jnp.where(row < batch, hinge, 0.0)

    # Per-tile partial sum, broadcast to a full lane-dense (8, 128) block so the
    # store is unmasked; the wrapper reads element [0, 0] of each tile's block.
    out_ref[...] = jnp.broadcast_to(jnp.sum(hinge), (8, 128))


def transe_forward(ent_emb, rel_emb, h_idx, r_idx, t_idx,
                   h_idx_neg, r_idx_neg, t_idx_neg, *,
                   margin=2.0, norm_p=1, b_tile=None):
    """Mirrors TransE.forward: returns the scalar margin-ranking loss."""
    B = int(h_idx.shape[0])
    ENT, D = ent_emb.shape
    REL, _ = rel_emb.shape

    if b_tile is None:
        # Keep tiles modest so (b_tile x ENT) one-hots + double buffering stay
        # well under the scoped VMEM limit on all generations (incl. v7x).
        b_tile = min(512, _round_up(B, 8))
    b_tile = max(8, _round_up(int(b_tile), 8))
    B_pad = _round_up(B, b_tile)
    num_tiles = B_pad // b_tile

    # Pack the six index vectors into one int32 array: (B_pad, 8).
    idx = jnp.stack([h_idx, r_idx, t_idx, h_idx_neg, r_idx_neg, t_idx_neg],
                    axis=1).astype(jnp.int32)                        # (B, 6)
    idx = jnp.pad(idx, ((0, B_pad - B), (0, 2)))                     # (B_pad, 8)

    ent32 = ent_emb.astype(jnp.float32)
    rel32 = rel_emb.astype(jnp.float32)

    kernel = functools.partial(
        _transe_loss_kernel,
        margin=float(margin), norm_p=int(norm_p), batch=B,
        b_tile=b_tile, ent_num=int(ENT), rel_num=int(REL), dim=int(D))

    flops = 2 * B_pad * D * (4 * ENT + 2 * REL) + 10 * B_pad * D
    bytes_accessed = (idx.size * 4 + ent32.size * 4 + rel32.size * 4
                      + num_tiles * 8 * 128 * 4)

    out = pl.pallas_call(
        kernel,
        out_shape=jax.ShapeDtypeStruct((num_tiles * 8, 128), jnp.float32),
        grid=(num_tiles,),
        in_specs=[
            pl.BlockSpec((b_tile, 8), lambda i: (i, 0)),   # packed indices
            pl.BlockSpec((ENT, D), lambda i: (0, 0)),      # entity table (resident)
            pl.BlockSpec((REL, D), lambda i: (0, 0)),      # relation table (resident)
        ],
        out_specs=pl.BlockSpec((8, 128), lambda i: (i, 0)),
        compiler_params=pltpu.CompilerParams(
            dimension_semantics=("parallel",)),
        cost_estimate=pl.CostEstimate(
            flops=int(flops), transcendentals=0,
            bytes_accessed=int(bytes_accessed)),
    )(idx, ent32, rel32)

    partials = out.reshape(num_tiles, 8, 128)[:, 0, 0]               # (num_tiles,)
    return jnp.sum(partials) / B


def init_embedding(key, num, dim):
    """Xavier-uniform init followed by row-wise L2 normalization (as in __init__)."""
    bound = (6.0 / (num + dim)) ** 0.5
    w = jax.random.uniform(key, (num, dim), jnp.float32, -bound, bound)
    w = w / jnp.linalg.norm(w, ord=2, axis=1, keepdims=True)
    return w


def _reference_forward(ent_emb, rel_emb, h, r, t, hn, rn, tn, margin=2.0, norm_p=1):
    def dist(hh, rr, tt):
        d = jnp.take(ent_emb, hh, 0) + jnp.take(rel_emb, rr, 0) - jnp.take(ent_emb, tt, 0)
        if norm_p == 1:
            return jnp.sum(jnp.abs(d), axis=1)
        return jnp.sqrt(jnp.sum(d * d, axis=1))
    pos = dist(h, r, t)
    neg = dist(hn, rn, tn)
    return jnp.mean(jnp.maximum(pos - neg + margin, 0.0))


if __name__ == "__main__":
    # Small synthetic configuration consistent with the module:
    ent_num, rel_num, dim = 64, 16, 32
    batch = 8
    margin, norm_p = 2.0, 1

    key = jax.random.PRNGKey(0)
    k_ent, k_rel, k1, k2, k3, k4, k5, k6 = jax.random.split(key, 8)

    ent_emb = init_embedding(k_ent, ent_num, dim)
    rel_emb = init_embedding(k_rel, rel_num, dim)

    h_idx = jax.random.randint(k1, (batch,), 0, ent_num)
    r_idx = jax.random.randint(k2, (batch,), 0, rel_num)
    t_idx = jax.random.randint(k3, (batch,), 0, ent_num)
    h_idx_neg = jax.random.randint(k4, (batch,), 0, ent_num)
    r_idx_neg = jax.random.randint(k5, (batch,), 0, rel_num)
    t_idx_neg = jax.random.randint(k6, (batch,), 0, ent_num)

    loss = transe_forward(ent_emb, rel_emb, h_idx, r_idx, t_idx,
                          h_idx_neg, r_idx_neg, t_idx_neg,
                          margin=margin, norm_p=norm_p)
    jax.block_until_ready(loss)

    ref = _reference_forward(ent_emb, rel_emb, h_idx, r_idx, t_idx,
                             h_idx_neg, r_idx_neg, t_idx_neg,
                             margin=margin, norm_p=norm_p)
    assert jnp.allclose(loss, ref, atol=1e-5, rtol=1e-5), (loss, ref)

    print("KERNEL_OK")
</pallas_src>

<mosaic_0001>
module attributes {stable_mosaic.version = 11 : i64} {
  func.func @_transe_loss_kernel(%arg0: i32, %arg1: memref<8x8xi32, #tpu.memory_space<vmem>>, %arg2: memref<64x32xf32, #tpu.memory_space<vmem>>, %arg3: memref<16x32xf32, #tpu.memory_space<vmem>>, %arg4: memref<8x128xf32, #tpu.memory_space<vmem>>) attributes {dimension_semantics = [#tpu.dimension_semantics<parallel>], iteration_bounds = array<i64: 1>, scalar_prefetch = 0 : i64, scratch_operands = 0 : i64, tpu.core_type = #tpu.core_type<tc>, window_params = [{transform_indices = @transform_0, window_bounds = array<i64: 8, 8>}, {pipeline_mode = #tpu.pipeline_mode<synchronous>, transform_indices = @transform_1, window_bounds = array<i64: 64, 32>}, {pipeline_mode = #tpu.pipeline_mode<synchronous>, transform_indices = @transform_2, window_bounds = array<i64: 16, 32>}, {transform_indices = @transform_3, window_bounds = array<i64: 8, 128>}]} {
    %c0 = arith.constant 0 : index
    %c0_0 = arith.constant 0 : index
    %0 = vector.load %arg1[%c0, %c0_0] : memref<8x8xi32, #tpu.memory_space<vmem>>, vector<8x8xi32>
    %c0_1 = arith.constant 0 : index
    %c0_2 = arith.constant 0 : index
    %1 = vector.load %arg2[%c0_1, %c0_2] : memref<64x32xf32, #tpu.memory_space<vmem>>, vector<64x32xf32>
    %c0_3 = arith.constant 0 : index
    %c0_4 = arith.constant 0 : index
    %2 = vector.load %arg3[%c0_3, %c0_4] : memref<16x32xf32, #tpu.memory_space<vmem>>, vector<16x32xf32>
    %3 = vector.extract_strided_slice %0 {offsets = [0, 0], sizes = [8, 1], strides = [1, 1]} : vector<8x8xi32> to vector<8x1xi32>
    %4 = tpu.iota {dimensions = array<i32: 1>} : vector<8x64xi32>
    %5 = vector.broadcast %3 : vector<8x1xi32> to vector<8x64xi32>
    %6 = arith.cmpi eq, %5, %4 : vector<8x64xi32>
    %7 = arith.extui %6 : vector<8x64xi1> to vector<8x64xi32>
    %8 = arith.sitofp %7 : vector<8x64xi32> to vector<8x64xf32>
    %cst = arith.constant dense<0.000000e+00> : vector<8x32xf32>
    %9 = tpu.matmul %8, %1, %cst {dimension_numbers = #tpu.dot_dimension_numbers<[1], [0], [0], [1], [0, 0, 1, 1], [], []>} : vector<8x64xf32>, vector<64x32xf32>, vector<8x32xf32> -> vector<8x32xf32>
    %10 = vector.extract_strided_slice %0 {offsets = [0, 1], sizes = [8, 1], strides = [1, 1]} : vector<8x8xi32> to vector<8x1xi32>
    %11 = tpu.iota {dimensions = array<i32: 1>} : vector<8x16xi32>
    %12 = vector.broadcast %10 : vector<8x1xi32> to vector<8x16xi32>
    %13 = arith.cmpi eq, %12, %11 : vector<8x16xi32>
    %14 = arith.extui %13 : vector<8x16xi1> to vector<8x16xi32>
    %15 = arith.sitofp %14 : vector<8x16xi32> to vector<8x16xf32>
    %cst_5 = arith.constant dense<0.000000e+00> : vector<8x32xf32>
    %16 = tpu.matmul %15, %2, %cst_5 {dimension_numbers = #tpu.dot_dimension_numbers<[1], [0], [0], [1], [0, 0, 1, 1], [], []>} : vector<8x16xf32>, vector<16x32xf32>, vector<8x32xf32> -> vector<8x32xf32>
    %17 = vector.extract_strided_slice %0 {offsets = [0, 2], sizes = [8, 1], strides = [1, 1]} : vector<8x8xi32> to vector<8x1xi32>
    %18 = tpu.iota {dimensions = array<i32: 1>} : vector<8x64xi32>
    %19 = vector.broadcast %17 : vector<8x1xi32> to vector<8x64xi32>
    %20 = arith.cmpi eq, %19, %18 : vector<8x64xi32>
    %21 = arith.extui %20 : vector<8x64xi1> to vector<8x64xi32>
    %22 = arith.sitofp %21 : vector<8x64xi32> to vector<8x64xf32>
    %cst_6 = arith.constant dense<0.000000e+00> : vector<8x32xf32>
    %23 = tpu.matmul %22, %1, %cst_6 {dimension_numbers = #tpu.dot_dimension_numbers<[1], [0], [0], [1], [0, 0, 1, 1], [], []>} : vector<8x64xf32>, vector<64x32xf32>, vector<8x32xf32> -> vector<8x32xf32>
    %24 = vector.extract_strided_slice %0 {offsets = [0, 3], sizes = [8, 1], strides = [1, 1]} : vector<8x8xi32> to vector<8x1xi32>
    %25 = tpu.iota {dimensions = array<i32: 1>} : vector<8x64xi32>
    %26 = vector.broadcast %24 : vector<8x1xi32> to vector<8x64xi32>
    %27 = arith.cmpi eq, %26, %25 : vector<8x64xi32>
    %28 = arith.extui %27 : vector<8x64xi1> to vector<8x64xi32>
    %29 = arith.sitofp %28 : vector<8x64xi32> to vector<8x64xf32>
    %cst_7 = arith.constant dense<0.000000e+00> : vector<8x32xf32>
    %30 = tpu.matmul %29, %1, %cst_7 {dimension_numbers = #tpu.dot_dimension_numbers<[1], [0], [0], [1], [0, 0, 1, 1], [], []>} : vector<8x64xf32>, vector<64x32xf32>, vector<8x32xf32> -> vector<8x32xf32>
    %31 = vector.extract_strided_slice %0 {offsets = [0, 4], sizes = [8, 1], strides = [1, 1]} : vector<8x8xi32> to vector<8x1xi32>
    %32 = tpu.iota {dimensions = array<i32: 1>} : vector<8x16xi32>
    %33 = vector.broadcast %31 : vector<8x1xi32> to vector<8x16xi32>
    %34 = arith.cmpi eq, %33, %32 : vector<8x16xi32>
    %35 = arith.extui %34 : vector<8x16xi1> to vector<8x16xi32>
    %36 = arith.sitofp %35 : vector<8x16xi32> to vector<8x16xf32>
    %cst_8 = arith.constant dense<0.000000e+00> : vector<8x32xf32>
    %37 = tpu.matmul %36, %2, %cst_8 {dimension_numbers = #tpu.dot_dimension_numbers<[1], [0], [0], [1], [0, 0, 1, 1], [], []>} : vector<8x16xf32>, vector<16x32xf32>, vector<8x32xf32> -> vector<8x32xf32>
    %38 = vector.extract_strided_slice %0 {offsets = [0, 5], sizes = [8, 1], strides = [1, 1]} : vector<8x8xi32> to vector<8x1xi32>
    %39 = tpu.iota {dimensions = array<i32: 1>} : vector<8x64xi32>
    %40 = vector.broadcast %38 : vector<8x1xi32> to vector<8x64xi32>
    %41 = arith.cmpi eq, %40, %39 : vector<8x64xi32>
    %42 = arith.extui %41 : vector<8x64xi1> to vector<8x64xi32>
    %43 = arith.sitofp %42 : vector<8x64xi32> to vector<8x64xf32>
    %cst_9 = arith.constant dense<0.000000e+00> : vector<8x32xf32>
    %44 = tpu.matmul %43, %1, %cst_9 {dimension_numbers = #tpu.dot_dimension_numbers<[1], [0], [0], [1], [0, 0, 1, 1], [], []>} : vector<8x64xf32>, vector<64x32xf32>, vector<8x32xf32> -> vector<8x32xf32>
    %45 = arith.addf %9, %16 : vector<8x32xf32>
    %46 = arith.subf %45, %23 : vector<8x32xf32>
    %47 = math.absf %46 : vector<8x32xf32>
    %cst_10 = arith.constant dense<0.000000e+00> : vector<8xf32>
    %48 = vector.multi_reduction <add>, %47, %cst_10 [1] : vector<8x32xf32> to vector<8xf32>
    %49 = vector.shape_cast %48 : vector<8xf32> to vector<8x1xf32>
    %50 = arith.addf %30, %37 : vector<8x32xf32>
    %51 = arith.subf %50, %44 : vector<8x32xf32>
    %52 = math.absf %51 : vector<8x32xf32>
    %cst_11 = arith.constant dense<0.000000e+00> : vector<8xf32>
    %53 = vector.multi_reduction <add>, %52, %cst_11 [1] : vector<8x32xf32> to vector<8xf32>
    %54 = vector.shape_cast %53 : vector<8xf32> to vector<8x1xf32>
    %55 = arith.subf %49, %54 : vector<8x1xf32>
    %cst_12 = arith.constant 2.000000e+00 : f32
    %56 = vector.broadcast %cst_12 : f32 to vector<8x1xf32>
    %57 = arith.addf %55, %56 : vector<8x1xf32>
    %cst_13 = arith.constant 0.000000e+00 : f32
    %58 = vector.broadcast %cst_13 : f32 to vector<8x1xf32>
    %59 = arith.maximumf %57, %58 : vector<8x1xf32>
    %c8_i32 = arith.constant 8 : i32
    %60 = arith.muli %arg0, %c8_i32 : i32
    %61 = tpu.iota {dimensions = array<i32: 0>} : vector<8x1xi32>
    %62 = vector.broadcast %60 : i32 to vector<8x1xi32>
    %63 = arith.addi %62, %61 : vector<8x1xi32>
    %c8_i32_14 = arith.constant 8 : i32
    %64 = vector.broadcast %c8_i32_14 : i32 to vector<8x1xi32>
    %65 = arith.cmpi slt, %63, %64 : vector<8x1xi32>
    %cst_15 = arith.constant 0.000000e+00 : f32
    %66 = vector.broadcast %cst_15 : f32 to vector<8x1xf32>
    %67 = arith.select %65, %59, %66 : vector<8x1xi1>, vector<8x1xf32>
    %68 = vector.shape_cast %67 : vector<8x1xf32> to vector<1x8x1xf32>
    %cst_16 = arith.constant dense<0.000000e+00> : vector<1xf32>
    %69 = vector.multi_reduction <add>, %68, %cst_16 [1, 2] : vector<1x8x1xf32> to vector<1xf32>
    %70 = vector.shape_cast %69 : vector<1xf32> to vector<1x1x1xf32>
    %71 = vector.extract %70[0, 0, 0] : f32 from vector<1x1x1xf32>
    %72 = vector.broadcast %71 : f32 to vector<8x128xf32>
    %c0_17 = arith.constant 0 : index
    %c0_18 = arith.constant 0 : index
    %73 = vector.load %arg4[%c0_17, %c0_18] : memref<8x128xf32, #tpu.memory_space<vmem>>, vector<8x128xf32>
    tpu.vector_store %arg4[%c0_17, %c0_18], %72 {strides = array<i32>} : memref<8x128xf32, #tpu.memory_space<vmem>>, vector<8x128xf32>,
    return
  }
  func.func @transform_0(%arg0: i32) -> (i32, i32) {
    %c0_i32 = arith.constant 0 : i32
    %c0_i32_0 = arith.constant 0 : i32
    return %arg0, %c0_i32 : i32, i32
  }
  func.func @transform_1(%arg0: i32) -> (i32, i32) {
    %c0_i32 = arith.constant 0 : i32
    %c0_i32_0 = arith.constant 0 : i32
    %c0_i32_1 = arith.constant 0 : i32
    return %c0_i32, %c0_i32_0 : i32, i32
  }
  func.func @transform_2(%arg0: i32) -> (i32, i32) {
    %c0_i32 = arith.constant 0 : i32
    %c0_i32_0 = arith.constant 0 : i32
    %c0_i32_1 = arith.constant 0 : i32
    return %c0_i32, %c0_i32_0 : i32, i32
  }
  func.func @transform_3(%arg0: i32) -> (i32, i32) {
    %c0_i32 = arith.constant 0 : i32
    %c0_i32_0 = arith.constant 0 : i32
    return %arg0, %c0_i32 : i32, i32
  }
}

</mosaic_0001>

<bundles_post_ra>
// kernel: tpu_custom_call.1
= control target key start
LH: loop header
LB: loop body
LE: loop exit
PB: predicated region body
PF: predicated region fallthrough
CT: control target
= control target key end

     0   :  { %v795_v2 = vmov 1   ;;  %v796_v3 = vmov 0   ;;  %s920_s0 = inlined_call_operand.vmem [shape: s32[8,8], index: 0, kind: input, shape index: {}]   ;;  %s921_s1 = inlined_call_operand.vmem [shape: f32[64,32], index: 1, kind: input, shape index: {}]   ;;  %s922_s2 = inlined_call_operand.vmem [shape: f32[16,32], index: 2, kind: input, shape index: {}]   ;;  %s923_s3 = inlined_call_operand.hbm [shape: f32[8,128], index: 3, kind: output, shape index: {}]  }
   0x1   :  { %v15_v0 = vld [vmem:[%s920_s0] sm:$0xff]  ;;  %765 = vset.pattern.permute.xlu0 %v795_v2  ;;  %767 = vset.pattern.permute.xlu1 %v796_v3  ;;  %v25_v4 = vld [vmem:[%s922_s2 + $0x8] sm:$0xff] }
   0x2   :  { %v24_v1 = vld [vmem:[%s922_s2] sm:$0xff] }
   0x3   :  { %8 = vsyncpa [#allocation3], 0  ;;  %35 = vperm.xlu0 %765, %v15_v0   ;;  %29 = vperm.xlu1 %767, %v15_v0   ;;  %v697_v5 = vpack.c.bf16 %v25_v4, %v24_v1  ;;  %v797_v6 = vmov 0.0|0.0   ;;  %vm798_vm0 = vmmov 0   ;;  %v799_v7 = vmov 0.0   ;;  %v16_v14 = vld [vmem:[%s921_s1] sm:$0xff] }
   0x4   :  { %696 = vmatprep.subr.bf16.mxu1 %v797_v6  ;;  %610 = vmatprep.mubr.msk.f32.mxu1 %vm798_vm0, %v799_v7  ;;  %v800_v8 = vmov 4   ;;  %v801_v9 = vmov 2   ;;  %v802_v10 = vmov 5   ;;  %v803_v11 = vmov 3   ;;  %v17_v15 = vld [vmem:[%s921_s1 + $0x8] sm:$0xff]  ;;  %v18_v18 = vld [vmem:[%s921_s1 + $0x10] sm:$0xff] }
   0x5   :  { %698 = vmatpush3.bf16.msra.mxu1 %v697_v5  ;;  %711 = vmatprep.subr.bf16.mxu0 %v797_v6  ;;  %v26_v12 = vlaneseq  ;;  %vm40_vm1 = vcmask 130048   ;;  %v700_v17 = vpack.c.bf16 %v17_v15, %v16_v14  ;;  %v19_v19 = vld [vmem:[%s921_s1 + $0x18] sm:$0xff]  ;;  %v20_v24 = vld [vmem:[%s921_s1 + $0x20] sm:$0xff]  ;;  %v21_v25 = vld [vmem:[%s921_s1 + $0x28] sm:$0xff]  ;;  %vm120_vm5 = vcmask 523264  }
   0x6   :  { %713 = vmatpush3.bf16.msra.mxu0 %v697_v5  ;;  %699 = vmatprep.subr.bf16.mxu1 %v797_v6  ;;  %v703_v21 = vpack.c.bf16 %v19_v19, %v18_v18  ;;  %v706_v27 = vpack.c.bf16 %v21_v25, %v20_v24  ;;  %v22_v28 = vld [vmem:[%s921_s1 + $0x30] sm:$0xff]  ;;  %v23_v29 = vld [vmem:[%s921_s1 + $0x38] sm:$0xff]  ;;  %vm433_vm9 = vcmask 261120   ;;  %vm525_vm10 = vcmask 7168   ;;  %s804_s1 = smov [#allocation2]  }
   0x7   :  { %766 = vset.pattern.permute.xlu0 %v800_v8  ;;  %768 = vset.pattern.permute.xlu1 %v801_v9  ;;  %v842_v13 = vand.u32 127, %v26_v12  ;;  %v709_v31 = vpack.c.bf16 %v23_v29, %v22_v28  ;;  %s544_s5 = sshll.u32 %s804_s1, 4  ;;  %s545_s5 = int_to_ptr.vmem [resolvable:$true] %s544_s5 }
   0x8   :  { %201 = vperm.xlu0 %766, %v15_v0   ;;  %115 = vperm.xlu1 %768, %v15_v0   ;;  %s771_s7 = scalar_lea.vmem %s545_s5, 128  ;;  %p776_p1 = scmp.lt.s32.totalorder %s545_s5, %s545_s5 }
   0x9   :  { %636 = vmatprep.mubr.msk.f32.mxu0 %vm798_vm0, %v799_v7  ;;  %726 = vmatprep.subr.bf16.mxu0 %v797_v6  ;;  %p772_p0 = scmp.ne.s32.totalorder %s545_s5, %s771_s7  ;;  %p777_p2 = scmp.lt.s32.totalorder %s771_s7, %s771_s7 }
   0xb   :  { %p778_p3 = por %p777_p2, %p776_p1 }
   0xc   :  { %770 = vset.pattern.permute.xlu0 %v802_v10  ;;  %769 = vset.pattern.permute.xlu1 %v803_v11 }
   0xd   :  { %280 = vperm.xlu0 %770, %v15_v0   ;;  %195 = vperm.xlu1 %769, %v15_v0   ;;  %p779_p4 = pnand %p778_p3, %p772_p0 }
  0x82   :  { %v36_v16 = vpop.permute.xlu0 %35  ;;  %v30_v22 = vpop.permute.xlu1 %29 }
  0x83   :  { %vm37_vm2 = vcmp.eq.s32.totalorder %v36_v16, %v842_v13  ;;  %vm31_vm6 = vcmp.eq.s32.totalorder %v30_v22, %v842_v13 }
  0x84   :  { %v553_v20 = vsel %vm37_vm2, 1.0, %v799_v7  ;;  %v552_v33 = vsel %vm31_vm6, 1.0, %v799_v7 }
  0x85   :  { %611 = vmatmul.mubr.msk.f32.vlgmr.msra.gmra.mrb[0].mxu1 %vm40_vm1, %v553_v20 }
  0x86   :  { %701 = vmatpush3.bf16.msra.mxu1 %v700_v17  ;;  %629 = vmatprep.mubr.msk.f32.mxu1 %vm798_vm0, %v799_v7 }
  0x87   :  { %v202_v23 = vpop.permute.xlu0 %201  ;;  %702 = vmatprep.subr.bf16.mxu1 %v797_v6  ;;  %v116_v30 = vpop.permute.xlu1 %115 }
  0x88   :  { %vm203_vm3 = vcmp.eq.s32.totalorder %v202_v23, %v842_v13  ;;  %vm117_vm4 = vcmp.eq.s32.totalorder %v116_v30, %v842_v13 }
  0x89   :  { %v558_v26 = vsel %vm203_vm3, 1.0, %v799_v7  ;;  %v555_v32 = vsel %vm117_vm4, 1.0, %v799_v7 }
  0x8a   :  { %637 = vmatmul.mubr.msk.f32.vlgmr.msra.gmra.mrb[0].mxu0 %vm40_vm1, %v558_v26  ;;  %704 = vmatpush3.bf16.msra.mxu1 %v703_v21 }
  0x8b   :  { %728 = vmatpush3.bf16.msra.mxu0 %v700_v17  ;;  %705 = vmatprep.subr.bf16.mxu1 %v797_v6 }
  0x8c   :  { %729 = vmatprep.subr.bf16.mxu0 %v797_v6  ;;  %674 = vmatprep.mubr.msk.f32.mxu0 %vm798_vm0, %v799_v7  ;;  %v281_v34 = vpop.permute.xlu0 %280  ;;  %v196_v35 = vpop.permute.xlu1 %195 }
  0x8d   :  { %vm282_vm7 = vcmp.eq.s32.totalorder %v281_v34, %v842_v13  ;;  %vm197_vm8 = vcmp.eq.s32.totalorder %v196_v35, %v842_v13 }
  0x8e   :  { %707 = vmatpush3.bf16.msra.mxu1 %v706_v27  ;;  %v560_v36 = vsel %vm282_vm7, 1.0, %v799_v7  ;;  %v557_v37 = vsel %vm197_vm8, 1.0, %v799_v7 }
  0x8f   :  { %731 = vmatpush3.bf16.msra.mxu0 %v703_v21  ;;  %708 = vmatprep.subr.bf16.mxu1 %v797_v6 }
  0x90   :  { %732 = vmatprep.subr.bf16.mxu0 %v797_v6 }
  0x92   :  { %710 = vmatpush3.bf16.msra.mxu1 %v709_v31 }
  0x93   :  { %734 = vmatpush3.bf16.msra.mxu0 %v706_v27  ;;  %714 = vmatprep.subr.bf16.mxu1 %v797_v6 }
  0x94   :  { %735 = vmatprep.subr.bf16.mxu0 %v797_v6 }
  0x95   :  { %630 = vmatmul.mubr.msk.f32.vlgmr.msra.gmra.mrb[2].mxu1 %vm120_vm5, %v555_v32 }
  0x96   :  { %716 = vmatpush3.bf16.msra.mxu1 %v700_v17  ;;  %655 = vmatprep.mubr.msk.f32.mxu1 %vm798_vm0, %v799_v7 }
  0x97   :  { %737 = vmatpush3.bf16.msra.mxu0 %v709_v31  ;;  %717 = vmatprep.subr.bf16.mxu1 %v797_v6 }
  0x98   :  { %738 = vmatprep.subr.bf16.mxu0 %v797_v6 }
  0x9a   :  { %675 = vmatmul.mubr.msk.f32.vlgmr.msra.gmra.mrb[2].mxu0 %vm120_vm5, %v552_v33  ;;  %719 = vmatpush3.bf16.msra.mxu1 %v703_v21 }
  0x9b   :  { %740 = vmatpush3.bf16.msra.mxu0 %v700_v17  ;;  %720 = vmatprep.subr.bf16.mxu1 %v797_v6 }
  0x9c   :  { %741 = vmatprep.subr.bf16.mxu0 %v797_v6  ;;  %693 = vmatprep.mubr.msk.f32.mxu0 %vm798_vm0, %v799_v7 }
  0x9e   :  { %722 = vmatpush3.bf16.msra.mxu1 %v706_v27 }
  0x9f   :  { %743 = vmatpush3.bf16.msra.mxu0 %v703_v21  ;;  %723 = vmatprep.subr.bf16.mxu1 %v797_v6 }
  0xa0   :  { %744 = vmatprep.subr.bf16.mxu0 %v797_v6 }
  0xa2   :  { %725 = vmatpush3.bf16.msra.mxu1 %v709_v31 }
  0xa3   :  { %746 = vmatpush3.bf16.msra.mxu0 %v706_v27 }
  0xa4   :  { %747 = vmatprep.subr.bf16.mxu0 %v797_v6 }
  0xa5   :  { %656 = vmatmul.mubr.msk.f32.vlgmr.msra.gmra.mrb[4].mxu1 %vm120_vm5, %v560_v36 }
  0xa7   :  { %749 = vmatpush3.bf16.msra.mxu0 %v709_v31 }
  0xaa   :  { %694 = vmatmul.mubr.msk.f32.vlgmr.msra.gmra.mrb[0].mxu0 %vm120_vm5, %v557_v37 }
 0x158   :  { %v110_v38 = vpop.f32.mrb[0].mxu1 }
 0x159   :  { %v612_v39 = vpop.f32.mrb[1].mxu1 }
 0x168   :  { %v190_v40 = vpop.f32.mrb[2].mxu1 }
 0x169   :  { %v631_v41 = vpop.f32.mrb[3].mxu1 }
 0x16d   :  { %v427_v42 = vpop.f32.mrb[2].mxu0 }
 0x16e   :  { %v428_v43 = vadd.f32 %v427_v42, %v110_v38  ;;  %v676_v44 = vpop.f32.mrb[3].mxu0 }
 0x170   :  { %v431_v45 = vsub.f32 %v428_v43, %v190_v40 }
 0x172   :  { %v432_v46 = vand.u32 2147483647, %v431_v45 }
 0x174   :  { %v434_v47 = vsel %vm433_vm9, %v432_v46, 0.0 }
 0x175   :  { %435 = vadd.xlane.f32.xlu1 %v434_v47 }
 0x178   :  { %v354_v48 = vpop.f32.mrb[4].mxu1 }
 0x179   :  { %v657_v49 = vpop.f32.mrb[5].mxu1 }
 0x17d   :  { %v506_v50 = vpop.f32.mrb[0].mxu0 }
 0x17e   :  { %v510_v51 = vsub.f32 %v506_v50, %v354_v48  ;;  %v695_v52 = vpop.f32.mrb[1].mxu0 }
 0x180   :  { %v511_v53 = vand.u32 2147483647, %v510_v51 }
 0x182   :  { %v512_v54 = vsel %vm433_vm9, %v511_v53, 0.0 }
 0x183   :  { %513 = vadd.xlane.f32.xlu0 %v512_v54 }
 0x202   :  { %v436_v55 = vpop.xlane.xlu1 %435 }
 0x210   :  { %v514_v56 = vpop.xlane.xlu0 %513 }
 0x211   :  { %v515_v57 = vsub.f32 %v436_v55, %v514_v56 }
 0x213   :  { %v516_v58 = vadd.f32 2.0, %v515_v57 }
 0x215   :  { %v517_v59 = vmax.f32 %v516_v58, 0.0 }
 0x217   :  { %v526_v60 = vsel %vm525_vm10, %v517_v59, 0.0 }
 0x218   :  { %527 = vadd.xlane.f32.xlu1 %v526_v60 }
 0x2a5   :  { %v528_v61 = vpop.xlane.xlu1 %527 }
 0x2a6   :  { %v529_v62 = vrot.slane %v528_v61, 4 }
 0x2a8   :  { %v530_v63 = vadd.f32 %v529_v62, %v528_v61 }
 0x2aa   :  { %v531_v0 = vrot.slane %v530_v63, 2 }
 0x2ac   :  { %v532_v1 = vadd.f32 %v531_v0, %v530_v63 }
 0x2ae   :  { %v533_v2 = vrot.slane %v532_v1, 1 }
 0x2b0   :  { %v534_v3 = vadd.f32 %v533_v2, %v532_v1 }
 0x2b2   :  { %753 = vpush %v534_v3 }
 0x2e3   :  { %s754_s6 = spop %753 }
 0x2e4   :  { %v536_v4 = vstv %s754_s6 }
 0x2e5   :  { %537 = vst [vmem:[#allocation2] sm:$0xff] %v536_v4 }
 0x2e6   :  { %782 = shalt.err (!%p779_p4)
}
 0x2e7   :  { %s783_s10 = scalar_lea.hbm %s923_s3, 128 }
 0x2e8   :  { %p784_p5 = scmp.ne.s32.totalorder %s923_s3, %s783_s10  ;;  %p787_p6 = scmp.lt.u32.totalorder %s783_s10, %s923_s3 }
 0x2ea   :  { %p789_p7 = pnand %p787_p6, %p784_p5 }
 0x2ec   :  { %792 = shalt.err (!%p789_p7)
}
 0x2ed   :  { %547 = dma.vmem_to_hbm [thread:$0]  %s545_s5, 128, %s923_s3, [#allocation3]  }
 0x2ee   :  { %793 = dma.done.wait [#allocation3], 128  }
 0x2ef   :  { %794 = vsyncadd [#allocation3], 4294967168 }
 0x2f0   :  { %551 = vsyncpa [#allocation3], 1 }

</bundles_post_ra>
